<compile_context>
chip_gen: v6e
topology: v6e:2x2x1
jax: 0.10.0
libtpu: 0.0.40
codegen_flags: <defaults>
</compile_context>

<pallas_src>
import jax
import jax.numpy as jnp
from jax.experimental import pallas as pl
from jax.experimental.pallas import tpu as pltpu


def _round_up(x, m):
    return (x + m - 1) // m * m


def _cdiv(a, b):
    return -(-a // b)


def _vmem_budget_bytes():
    """Generation-aware VMEM budget: 3/4 of physical capacity (48 MiB on v7x,
    96 MiB on v5e/v6e); conservative fallback if the query is unavailable."""
    try:
        cap = pltpu.get_tpu_info().vmem_capacity_bytes
    except Exception:
        cap = 64 << 20  # assume the smallest (v7x) VMEM
    return int(cap) * 3 // 4


def _select_tiles(n_min, m_min, d, budget_bytes):
    """Pick (TN, TM) near the 1024x2048 targets such that they divide the
    (minimally re-padded) extents and the double-buffered f32 footprint fits
    the VMEM budget. n_min is a multiple of 8, m_min a multiple of 128."""
    tgt_tn, tgt_tm = 1024, 2048
    while True:
        gn = _cdiv(n_min, tgt_tn)
        tn = _round_up(_cdiv(n_min, gn), 8)
        gm = _cdiv(m_min, tgt_tm)
        tm = _round_up(_cdiv(m_min, gm), 128)
        # double-buffered f32 footprint: x, ct, sxx, scc, out tiles
        est = 2 * 4 * (tn * d + d * tm + tn + tm + tn * tm)
        if est <= budget_bytes or (tgt_tn <= 8 and tgt_tm <= 128):
            return tn, tm, tn * gn, tm * gm
        # Shrink whichever target buys back more VMEM (ct/out scale with TM,
        # x/out scale with TN), respecting the (8, 128) layout minimum.
        if tgt_tm > 128 and (tgt_tm * (d + tn) >= tgt_tn * (d + tm) or tgt_tn <= 8):
            tgt_tm //= 2
        else:
            tgt_tn //= 2


def prepare_pattern_centers(centers, sigma, m_pad=None):
    """Centers-side precompute: (2s * centers^T, -s * ||c||^2), padded to
    m_pad columns. self.X is a fixed module parameter, so callers can (and
    should) cache this result across forward passes."""
    M, D = centers.shape
    if m_pad is None:
        m_pad = _round_up(M, 128)
    s = 1.0 / (2.0 * jnp.asarray(sigma, jnp.float32) ** 2)
    c = centers.astype(jnp.float32)
    if m_pad != M:
        c = jnp.pad(c, ((0, m_pad - M), (0, 0)))
    ct = (2.0 * s) * c.T                                    # (D, m_pad)
    scc = (-s) * jnp.sum(c * c, axis=-1)[None, :]           # (1, m_pad)
    return ct, scc


def _pattern_kernel(x_ref, ct_ref, sxx_ref, scc_ref, o_ref):
    # x_ref  : (TN, D)  query tile (f32)
    # ct_ref : (D, TM)  centers^T pre-scaled by 2s (MXU-natural orientation)
    # sxx_ref: (TN, 1)  -s * ||x||^2 per query row
    # scc_ref: (1, TM)  -s * ||c||^2 per center column
    # o_ref  : (TN, TM) output tile
    logit = jnp.dot(x_ref[...], ct_ref[...],
                    preferred_element_type=jnp.float32,
                    precision=jax.lax.Precision.HIGHEST)     # (TN, TM) on MXU
    logit = logit + sxx_ref[...] + scc_ref[...]              # = -s * d^2
    # d^2 >= 0 mathematically; clamp tiny positive FP error so output <= 1.
    o_ref[...] = jnp.exp(jnp.minimum(logit, 0.0)).astype(o_ref.dtype)


def pattern_layer(x, centers, sigma, *, out_dtype=jnp.float32, tn=None, tm=None):
    """x: (N, D) queries, centers: (M, D) stored patterns -> (N, M) Gaussian
    kernel similarities exp(-||x - c||^2 / (2 sigma^2))."""
    N, D = x.shape
    M, Dc = centers.shape
    assert D == Dc, "feature dims must match"

    budget = _vmem_budget_bytes()

    if tn is None or tm is None:
        TN, TM, N_pad, M_pad = _select_tiles(_round_up(N, 8),
                                             _round_up(M, 128), D, budget)
        if tn is not None:
            TN = tn
            N_pad = _round_up(N, TN)
        if tm is not None:
            TM = tm
            M_pad = _round_up(M, TM)
    else:
        TN, TM = tn, tm
        N_pad, M_pad = _round_up(N, TN), _round_up(M, TM)

    # Query-side precompute (per call) — O(N*D), negligible vs O(N*M) output.
    s = 1.0 / (2.0 * jnp.asarray(sigma, jnp.float32) ** 2)
    x_p = x.astype(jnp.float32)
    if N_pad != N:
        x_p = jnp.pad(x_p, ((0, N_pad - N), (0, 0)))
    sxx = (-s) * jnp.sum(x_p * x_p, axis=-1, keepdims=True)  # (N_pad, 1)

    # Centers-side precompute — hoist/cache this across calls when self.X is fixed.
    ct, scc = prepare_pattern_centers(centers, sigma, m_pad=M_pad)

    n_blocks = N_pad // TN
    m_blocks = M_pad // TM

    # Put the axis with more blocks first so v7x's two TensorCores both get
    # work even for small-N / large-M serving shapes. Both axes independent.
    if m_blocks > n_blocks:
        grid = (m_blocks, n_blocks)
        x_map = lambda j, i: (i, 0)
        ct_map = lambda j, i: (0, j)
        xx_map = lambda j, i: (i, 0)
        cc_map = lambda j, i: (0, j)
        o_map = lambda j, i: (i, j)
    else:
        grid = (n_blocks, m_blocks)
        x_map = lambda i, j: (i, 0)
        ct_map = lambda i, j: (0, j)
        xx_map = lambda i, j: (i, 0)
        cc_map = lambda i, j: (0, j)
        o_map = lambda i, j: (i, j)

    out = pl.pallas_call(
        _pattern_kernel,
        out_shape=jax.ShapeDtypeStruct((N_pad, M_pad), out_dtype),
        grid_spec=pltpu.PrefetchScalarGridSpec(
            num_scalar_prefetch=0,
            grid=grid,
            in_specs=[
                pl.BlockSpec((TN, D), x_map),    # query tile
                pl.BlockSpec((D, TM), ct_map),   # scaled centers^T tile
                pl.BlockSpec((TN, 1), xx_map),   # -s * ||x||^2
                pl.BlockSpec((1, TM), cc_map),   # -s * ||c||^2
            ],
            out_specs=pl.BlockSpec((TN, TM), o_map),
        ),
        compiler_params=pltpu.CompilerParams(
            dimension_semantics=("parallel", "parallel"),
            vmem_limit_bytes=budget,
        ),
    )(x_p, ct, sxx, scc)

    return out[:N, :M]


if __name__ == "__main__":
    key = jax.random.PRNGKey(0)
    k1, k2 = jax.random.split(key)

    N, M, D = 8, 16, 32      # 8 queries, 16 stored patterns, 32 features
    sigma = 1.5

    x = jax.random.normal(k1, (N, D), dtype=jnp.float32)        # forward input X
    centers = jax.random.normal(k2, (M, D), dtype=jnp.float32)  # module's self.X

    out = pattern_layer(x, centers, sigma)
    out = jax.block_until_ready(out)

    # pure-JAX reference: exp(-||x-c||^2 / (2 sigma^2))
    diff = x[:, None, :] - centers[None, :, :]
    ref = jnp.exp(-jnp.sum(diff * diff, axis=-1) / (2.0 * sigma ** 2))
    assert out.shape == (N, M)
    assert jnp.max(jnp.abs(out - ref)) < 1e-5

    print("KERNEL_OK")
</pallas_src>

<mosaic_0001>
module attributes {stable_mosaic.version = 11 : i64} {
  func.func @_pattern_kernel(%arg0: i32, %arg1: i32, %arg2: memref<8x32xf32, #tpu.memory_space<vmem>>, %arg3: memref<32x128xf32, #tpu.memory_space<vmem>>, %arg4: memref<8x1xf32, #tpu.memory_space<vmem>>, %arg5: memref<1x128xf32, #tpu.memory_space<vmem>>, %arg6: memref<8x128xf32, #tpu.memory_space<vmem>>) attributes {dimension_semantics = [#tpu.dimension_semantics<parallel>, #tpu.dimension_semantics<parallel>], iteration_bounds = array<i64: 1, 1>, scalar_prefetch = 0 : i64, scratch_operands = 0 : i64, tpu.core_type = #tpu.core_type<tc>, window_params = [{transform_indices = @transform_0, window_bounds = array<i64: 8, 32>}, {transform_indices = @transform_1, window_bounds = array<i64: 32, 128>}, {transform_indices = @transform_2, window_bounds = array<i64: 8, 1>}, {transform_indices = @transform_3, window_bounds = array<i64: 1, 128>}, {transform_indices = @transform_4, window_bounds = array<i64: 8, 128>}]} {
    %c0 = arith.constant 0 : index
    %c0_0 = arith.constant 0 : index
    %0 = vector.load %arg2[%c0, %c0_0] : memref<8x32xf32, #tpu.memory_space<vmem>>, vector<8x32xf32>
    %c0_1 = arith.constant 0 : index
    %c0_2 = arith.constant 0 : index
    %1 = vector.load %arg3[%c0_1, %c0_2] : memref<32x128xf32, #tpu.memory_space<vmem>>, vector<32x128xf32>
    %cst = arith.constant dense<0.000000e+00> : vector<8x128xf32>
    %2 = tpu.matmul %0, %1, %cst {dimension_numbers = #tpu.dot_dimension_numbers<[1], [0], [0], [1], [0, 0, 1, 1], [], []>, precision = #tpu.contract_precision<fp32>} : vector<8x32xf32>, vector<32x128xf32>, vector<8x128xf32> -> vector<8x128xf32>
    %c0_3 = arith.constant 0 : index
    %c0_4 = arith.constant 0 : index
    %3 = vector.load %arg4[%c0_3, %c0_4] : memref<8x1xf32, #tpu.memory_space<vmem>>, vector<8x1xf32>
    %4 = vector.broadcast %3 : vector<8x1xf32> to vector<8x128xf32>
    %5 = arith.addf %2, %4 : vector<8x128xf32>
    %c0_5 = arith.constant 0 : index
    %c0_6 = arith.constant 0 : index
    %6 = vector.load %arg5[%c0_5, %c0_6] : memref<1x128xf32, #tpu.memory_space<vmem>>, vector<1x128xf32>
    %7 = vector.broadcast %6 : vector<1x128xf32> to vector<8x128xf32>
    %8 = arith.addf %5, %7 : vector<8x128xf32>
    %cst_7 = arith.constant 0.000000e+00 : f32
    %9 = vector.broadcast %cst_7 : f32 to vector<8x128xf32>
    %10 = arith.minimumf %8, %9 : vector<8x128xf32>
    %11 = math.exp %10 : vector<8x128xf32>
    %c0_8 = arith.constant 0 : index
    %c0_9 = arith.constant 0 : index
    %12 = vector.load %arg6[%c0_8, %c0_9] : memref<8x128xf32, #tpu.memory_space<vmem>>, vector<8x128xf32>
    tpu.vector_store %arg6[%c0_8, %c0_9], %11 {strides = array<i32>} : memref<8x128xf32, #tpu.memory_space<vmem>>, vector<8x128xf32>,
    return
  }
  func.func @transform_0(%arg0: i32, %arg1: i32) -> (i32, i32) {
    %c0_i32 = arith.constant 0 : i32
    %c0_i32_0 = arith.constant 0 : i32
    return %arg0, %c0_i32 : i32, i32
  }
  func.func @transform_1(%arg0: i32, %arg1: i32) -> (i32, i32) {
    %c0_i32 = arith.constant 0 : i32
    %c0_i32_0 = arith.constant 0 : i32
    return %c0_i32, %arg1 : i32, i32
  }
  func.func @transform_2(%arg0: i32, %arg1: i32) -> (i32, i32) {
    %c0_i32 = arith.constant 0 : i32
    %c0_i32_0 = arith.constant 0 : i32
    return %arg0, %c0_i32 : i32, i32
  }
  func.func @transform_3(%arg0: i32, %arg1: i32) -> (i32, i32) {
    %c0_i32 = arith.constant 0 : i32
    %c0_i32_0 = arith.constant 0 : i32
    return %c0_i32, %arg1 : i32, i32
  }
  func.func @transform_4(%arg0: i32, %arg1: i32) -> (i32, i32) {
    %c0_i32 = arith.constant 0 : i32
    return %arg0, %arg1 : i32, i32
  }
}

</mosaic_0001>

<bundles_post_ra>
// kernel: tpu_custom_call.1
= control target key start
LH: loop header
LB: loop body
LE: loop exit
PB: predicated region body
PF: predicated region fallthrough
CT: control target
= control target key end

     0   :  { %9 = vsyncpa [#allocation3], 0  ;;  %s823_s0 = inlined_call_operand.vmem [shape: f32[8,32], index: 0, kind: input, shape index: {}]   ;;  %s824_s1 = inlined_call_operand.hbm [shape: f32[32,128], index: 1, kind: input, shape index: {}]   ;;  %s825_s2 = inlined_call_operand.vmem [shape: f32[8,1], index: 2, kind: input, shape index: {}]   ;;  %s826_s3 = inlined_call_operand.vmem [shape: f32[1,128], index: 3, kind: input, shape index: {}]   ;;  %s827_s4 = inlined_call_operand.hbm [shape: f32[8,128], index: 4, kind: output, shape index: {}]  }
   0x1   :  { %10 = vsyncpa [#allocation4], 0  ;;  %s710_s15 = smov [#allocation2]  }
   0x2   :  { %s18_s16 = sshll.u32 %s710_s15, 4  ;;  %s19_s16 = int_to_ptr.vmem [resolvable:$true] %s18_s16 }
   0x3   :  { %s674_s17 = scalar_lea.vmem %s19_s16, 512  ;;  %p679_p1 = scmp.lt.s32.totalorder %s19_s16, %s19_s16 }
   0x4   :  { %p675_p0 = scmp.ne.s32.totalorder %s19_s16, %s674_s17  ;;  %p680_p2 = scmp.lt.s32.totalorder %s674_s17, %s674_s17 }
   0x6   :  { %p681_p3 = por %p680_p2, %p679_p1 }
   0x8   :  { %p682_p4 = pnand %p681_p3, %p675_p0 }
   0xa   :  { %685 = shalt.err (!%p682_p4)
}
   0xb   :  { %s711_s18 = smov 128   ;;  %s712_s19 = smov 8  }
   0xc   :  { %24 = dma.hbm_to_vmem [thread:$0]  %s824_s1, 512, %s19_s16, [#allocation3], %s711_s18, %s711_s18, %s712_s19  }
   0xd   :  { %706 = dma.done.wait [#allocation3], 512  }
   0xe   :  { %707 = vsyncadd [#allocation3], 4294966784  ;;  %v713_v0 = vmov 0.0   ;;  %vm714_vm0 = vmmov 0   ;;  %v715_v1 = vmov 0   ;;  %vm43_vm1 = vcmask 261120  }
   0xf   :  { %590 = vmatprep.subr.mxu0 %v713_v0  ;;  %601 = vmatprep.subr.mxu1 %v713_v0  ;;  %v36_v2 = vld [vmem:[#allocation2 + $0x18] sm:$0xff]  ;;  %v35_v3 = vld [vmem:[#allocation2 + $0x10] sm:$0xff]  ;;  %v34_v4 = vld [vmem:[#allocation2 + $0x8] sm:$0xff]  ;;  %s716_s25 = smov [#allocation5]  }
  0x10   :  { %598 = vmatprep.mubr.msk.f32.mxu0 %vm714_vm0, %v713_v0  ;;  %609 = vmatprep.mubr.msk.f32.mxu1 %vm714_vm0, %v713_v0  ;;  %v751_v5 = vand.u32 4294901760, %v36_v2  ;;  %v753_v6 = vand.u32 4294901760, %v35_v3  ;;  %v755_v7 = vand.u32 4294901760, %v34_v4  ;;  %v33_v8 = vld [vmem:[#allocation2] sm:$0xff]  ;;  %s550_s26 = sshll.u32 %s716_s25, 4  ;;  %s551_s26 = int_to_ptr.vmem [resolvable:$true] %s550_s26 }
  0x11   :  { %663 = vset.pattern.permute.xlu0 %v715_v1  ;;  %v32_v9 = vld [vmem:[%s823_s0] sm:$0xff]  ;;  %v763_v11 = vand.u32 4294901760, %v33_v8  ;;  %s686_s27 = scalar_lea.vmem %s551_s26, 128  ;;  %p691_p6 = scmp.lt.s32.totalorder %s551_s26, %s551_s26 }
  0x12   :  { %v37_v10 = vld [vmem:[%s825_s2] sm:$0xff]  ;;  %v45_v12 = vsel %vm43_vm1, %v32_v9, 0  ;;  %591 = vmatpush3.msra.mxu0 %v751_v5  ;;  %v152_v13 = vsub.f32 %v36_v2, %v751_v5  ;;  %v159_v15 = vsub.f32 %v35_v3, %v753_v6  ;;  %v166_v16 = vsub.f32 %v34_v4, %v755_v7  ;;  %p687_p5 = scmp.ne.s32.totalorder %s551_s26, %s686_s27  ;;  %p692_p7 = scmp.lt.s32.totalorder %s686_s27, %s686_s27 }
  0x13   :  { %40 = vperm.xlu0 %663, %v37_v10   ;;  %v767_v14 = vand.u32 4294901760, %v45_v12  ;;  %592 = vmatprep.subr.mxu0 %v713_v0  ;;  %v173_v17 = vsub.f32 %v33_v8, %v763_v11  ;;  %v559_v51 = vld [vmem:[%s826_s3] ss:$0 sm:$0xff] }
  0x14   :  { %593 = vmatpush3.msra.mxu0 %v753_v6  ;;  %v153_v18 = vand.u32 4294901760, %v152_v13  ;;  %v160_v20 = vand.u32 4294901760, %v159_v15  ;;  %v167_v21 = vand.u32 4294901760, %v166_v16  ;;  %p693_p8 = por %p692_p7, %p691_p6 }
  0x15   :  { %v117_v19 = vsub.f32 %v45_v12, %v767_v14  ;;  %594 = vmatprep.subr.mxu0 %v713_v0  ;;  %v174_v22 = vand.u32 4294901760, %v173_v17 }
  0x16   :  { %595 = vmatpush3.msra.mxu0 %v755_v7  ;;  %v154_v23 = vsub.f32 %v152_v13, %v153_v18  ;;  %v161_v25 = vsub.f32 %v159_v15, %v160_v20  ;;  %v168_v26 = vsub.f32 %v166_v16, %v167_v21  ;;  %p694_p9 = pnand %p693_p8, %p687_p5 }
  0x17   :  { %v118_v24 = vand.u32 4294901760, %v117_v19  ;;  %596 = vmatprep.subr.mxu0 %v713_v0  ;;  %v175_v30 = vsub.f32 %v173_v17, %v174_v22 }
  0x18   :  { %597 = vmatpush3.msra.mxu0 %v763_v11  ;;  %v155_v27 = vand.u32 4294901760, %v154_v23  ;;  %v162_v29 = vand.u32 4294901760, %v161_v25  ;;  %v169_v32 = vand.u32 4294901760, %v168_v26 }
  0x19   :  { %v119_v28 = vsub.f32 %v117_v19, %v118_v24  ;;  %612 = vmatprep.subr.mxu0 %v713_v0  ;;  %v176_v33 = vand.u32 4294901760, %v175_v30 }
  0x1a   :  { %602 = vmatpush3.msra.mxu1 %v155_v27 }
  0x1b   :  { %v120_v31 = vand.u32 4294901760, %v119_v28  ;;  %603 = vmatprep.subr.mxu1 %v713_v0 }
  0x1c   :  { %604 = vmatpush3.msra.mxu1 %v162_v29 }
  0x1d   :  { %599 = vmatmul.mubr.f32.vlgmr.msra.gmra.mxu0 %v120_v31  ;;  %605 = vmatprep.subr.mxu1 %v713_v0 }
  0x1e   :  { %613 = vmatpush3.msra.mxu0 %v152_v13  ;;  %606 = vmatpush3.msra.mxu1 %v169_v32 }
  0x1f   :  { %614 = vmatprep.subr.mxu0 %v713_v0  ;;  %607 = vmatprep.subr.mxu1 %v713_v0 }
  0x20   :  { %615 = vmatpush3.msra.mxu0 %v159_v15  ;;  %608 = vmatpush3.msra.mxu1 %v176_v33 }
  0x21   :  { %616 = vmatprep.subr.mxu0 %v713_v0  ;;  %610 = vmatmul.mubr.f32.vlgmr.msra.gmra.mxu1 %v767_v14 }
  0x22   :  { %617 = vmatpush3.msra.mxu0 %v166_v16  ;;  %623 = vmatprep.subr.mxu1 %v713_v0 }
  0x23   :  { %618 = vmatprep.subr.mxu0 %v713_v0  ;;  %624 = vmatpush3.msra.mxu1 %v751_v5 }
  0x24   :  { %619 = vmatpush3.msra.mxu0 %v173_v17  ;;  %620 = vmatprep.mubr.msk.f32.mxu0 %vm714_vm0, %v713_v0 }
  0x25   :  { %625 = vmatprep.subr.mxu1 %v713_v0  ;;  %634 = vmatprep.subr.mxu0 %v713_v0 }
  0x26   :  { %621 = vmatmul.mubr.f32.vlgmr.msra.gmra.mxu0 %v117_v19  ;;  %626 = vmatpush3.msra.mxu1 %v753_v6 }
  0x27   :  { %635 = vmatpush3.msra.mxu0 %v153_v18  ;;  %627 = vmatprep.subr.mxu1 %v713_v0 }
  0x28   :  { %636 = vmatprep.subr.mxu0 %v713_v0  ;;  %628 = vmatpush3.msra.mxu1 %v755_v7 }
  0x29   :  { %637 = vmatpush3.msra.mxu0 %v160_v20  ;;  %629 = vmatprep.subr.mxu1 %v713_v0 }
  0x2a   :  { %638 = vmatprep.subr.mxu0 %v713_v0  ;;  %630 = vmatpush3.msra.mxu1 %v763_v11 }
  0x2b   :  { %631 = vmatprep.mubr.msk.f32.mxu1 %vm714_vm0, %v713_v0  ;;  %639 = vmatpush3.msra.mxu0 %v167_v21 }
  0x2c   :  { %632 = vmatmul.mubr.f32.vlgmr.msra.gmra.mxu1 %v118_v24  ;;  %640 = vmatprep.subr.mxu0 %v713_v0 }
  0x2d   :  { %645 = vmatprep.subr.mxu1 %v713_v0  ;;  %641 = vmatpush3.msra.mxu0 %v174_v22 }
  0x2e   :  { %642 = vmatprep.mubr.msk.f32.mxu0 %vm714_vm0, %v713_v0  ;;  %646 = vmatpush3.msra.mxu1 %v751_v5 }
  0x2f   :  { %643 = vmatmul.mubr.f32.vlgmr.msra.gmra.mxu0 %v767_v14  ;;  %647 = vmatprep.subr.mxu1 %v713_v0 }
  0x30   :  { %653 = vmatprep.mubr.msk.f32.mxu1 %vm714_vm0, %v713_v0  ;;  %648 = vmatpush3.msra.mxu1 %v753_v6 }
  0x31   :  { %649 = vmatprep.subr.mxu1 %v713_v0 }
  0x32   :  { %650 = vmatpush3.msra.mxu1 %v755_v7 }
  0x33   :  { %651 = vmatprep.subr.mxu1 %v713_v0 }
  0x34   :  { %652 = vmatpush3.msra.mxu1 %v763_v11 }
  0x35   :  { %654 = vmatmul.mubr.f32.vlgmr.msra.gmra.mxu1 %v767_v14 }
  0x8e   :  { %v41_v37 = vpop.permute.xlu0 %40 }
  0xdd   :  { %v122_v34 = vpop.f32.mrf.mxu0 }
  0xde   :  { %v123_v40 = vadd.f32 %v122_v34, %v41_v37 }
  0xdf   :  { %v600_v35 = vpop.f32.mrf.mxu0 }
  0xe1   :  { %v213_v36 = vpop.f32.mrf.mxu1 }
  0xe2   :  { %v214_v42 = vadd.f32 %v213_v36, %v123_v40 }
  0xe3   :  { %v611_v38 = vpop.f32.mrf.mxu1 }
  0xe6   :  { %v293_v39 = vpop.f32.mrf.mxu0 }
  0xe7   :  { %v294_v45 = vadd.f32 %v293_v39, %v214_v42 }
  0xe8   :  { %v622_v41 = vpop.f32.mrf.mxu0 }
  0xec   :  { %v370_v43 = vpop.f32.mrf.mxu1 }
  0xed   :  { %v371_v47 = vadd.f32 %v370_v43, %v294_v45 }
  0xee   :  { %v633_v44 = vpop.f32.mrf.mxu1 }
  0xef   :  { %v453_v46 = vpop.f32.mrf.mxu0 }
  0xf0   :  { %v454_v49 = vadd.f32 %v453_v46, %v371_v47 }
  0xf1   :  { %v644_v48 = vpop.f32.mrf.mxu0 }
  0xf5   :  { %v528_v50 = vpop.f32.mrf.mxu1 }
  0xf6   :  { %v529_v52 = vadd.f32 %v528_v50, %v454_v49 }
  0xf7   :  { %v655_v53 = vpop.f32.mrf.mxu1 }
  0xf8   :  { %v539_v54 = vadd.f32 %v559_v51, %v529_v52 }
  0xfa   :  { %v540_v55 = vmin.f32 %v539_v54, 0.0 }
  0xfc   :  { %v541_v56 = vmul.f32 1.442695, %v540_v55 }
  0xfe   :  { %664 = vpow2.f32 %v541_v56 }
 0x10b   :  { %v665_v57 = vpop.eup %664 }
 0x10c   :  { %543 = vst [vmem:[#allocation5] sm:$0xff] %v665_v57 }
 0x10d   :  { %697 = shalt.err (!%p694_p9)
}
 0x10e   :  { %553 = dma.vmem_to_hbm [thread:$0]  %s551_s26, 128, %s827_s4, [#allocation4]  }
 0x10f   :  { %708 = dma.done.wait [#allocation4], 128  }
 0x110   :  { %709 = vsyncadd [#allocation4], 4294967168 }
 0x111   :  { %557 = vsyncpa [#allocation3], 1 }
 0x112   :  { %558 = vsyncpa [#allocation4], 1 }

</bundles_post_ra>
